<compile_context>
chip_gen: v6e
topology: v6e:2x2x1
jax: 0.10.0
libtpu: 0.0.40
codegen_flags: <defaults>
</compile_context>

<pallas_src>
import math
import functools

import jax
import jax.numpy as jnp
from jax.experimental import pallas as pl
from jax.experimental.pallas import tpu as pltpu


def _round_up(v, m):
    return (v + m - 1) // m * m


def _cdiv(a, b):
    return (a + b - 1) // b


# ---------------------------------------------------------------------------
# Glue: sinusoidal timestep embedding (matches torch timestep_embedding)
# ---------------------------------------------------------------------------
def timestep_embedding(timesteps, dim, max_period=10000):
    half = dim // 2
    freqs = jnp.exp(
        -math.log(max_period) * jnp.arange(0, half, dtype=jnp.float32) / half
    )
    args = timesteps[:, None].astype(jnp.float32) * freqs[None]
    embedding = jnp.concatenate([jnp.cos(args), jnp.sin(args)], axis=-1)
    if dim % 2:
        embedding = jnp.concatenate(
            [embedding, jnp.zeros_like(embedding[:, :1])], axis=-1
        )
    return embedding


# ---------------------------------------------------------------------------
# Pallas kernel
# ---------------------------------------------------------------------------
# Rows in the packed [10, >=256] f32 bias array (static layout).
_B_IN, _B1A, _B2A, _B1BSC, _B2B, _B1C, _B2C, _B1DSC, _B2D, _BOUT = range(10)


def _resnet_kernel(xt_ref, b_ref,
                   w_in, w1a, w2a, w1bsc, w2b, w1c, w2c, w1dsc, w2d, w_out,
                   o_ref):
    b_all = b_ref[...]                       # [10, BW] f32, loaded once per step

    def bias(row, w):
        # One row per bias; every slice starts at lane 0 -> no XLU rotates.
        return b_all[row:row + 1, :w.shape[-1]]

    def mm(h, w_ref):
        # bf16 operands on the MXU, f32 accumulation.
        return jnp.dot(h.astype(jnp.bfloat16), w_ref[...],
                       preferred_element_type=jnp.float32)

    def relu(v):
        return jnp.maximum(v, 0.0)

    xt = xt_ref[...]                         # bf16 [TM, D_in + E]

    # input layer (emb_layer folded in; x|temb pre-concatenated in wrapper)
    h = mm(xt, w_in) + bias(_B_IN, w_in)

    # ResidualBlock(64, 64): identity shortcut
    out = relu(mm(h, w1a) + bias(_B1A, w1a))
    h = relu(mm(out, w2a) + bias(_B2A, w2a) + h)

    # ResidualBlock(64, 128): lin1 + linear shortcut fused into one matmul
    cat = mm(h, w1bsc) + bias(_B1BSC, w1bsc)          # [TM, 256] = [lin1|sc]
    h = relu(mm(relu(cat[:, :128]), w2b) + bias(_B2B, w2b) + cat[:, 128:])

    # ResidualBlock(128, 128): identity shortcut
    out = relu(mm(h, w1c) + bias(_B1C, w1c))
    h = relu(mm(out, w2c) + bias(_B2C, w2c) + h)

    # ResidualBlock(128, 64): lin1 + linear shortcut fused into one matmul
    cat = mm(h, w1dsc) + bias(_B1DSC, w1dsc)          # [TM, 128] = [lin1|sc]
    h = relu(mm(relu(cat[:, :64]), w2d) + bias(_B2D, w2d) + cat[:, 64:])

    # output layer; bf16 store halves HBM writeback
    o_ref[...] = (mm(h, w_out) + bias(_BOUT, w_out)).astype(o_ref.dtype)


# ---------------------------------------------------------------------------
# Parameter construction (module-faithful layout, xavier-normal-like)
# ---------------------------------------------------------------------------
def _make_linear(key, in_dim, out_dim):
    kw, kb = jax.random.split(key)
    std = math.sqrt(2.0 / (in_dim + out_dim))            # xavier normal gain=1
    w = jax.random.normal(kw, (in_dim, out_dim), jnp.float32) * std
    b = jax.random.normal(kb, (out_dim,), jnp.float32) * 1e-6
    return w, b


def make_params(key, in_dim0, out_dim0, emb_size):
    ks = jax.random.split(key, 13)
    p = {}
    p["emb"] = _make_linear(ks[0], emb_size, emb_size)
    p["input"] = _make_linear(ks[1], in_dim0 + emb_size, 64)
    p["rb1_l1"] = _make_linear(ks[2], 64, 64)
    p["rb1_l2"] = _make_linear(ks[3], 64, 64)
    p["rb2_l1"] = _make_linear(ks[4], 64, 128)
    p["rb2_l2"] = _make_linear(ks[5], 128, 128)
    p["rb2_sc"] = _make_linear(ks[6], 64, 128)
    p["rb3_l1"] = _make_linear(ks[7], 128, 128)
    p["rb3_l2"] = _make_linear(ks[8], 128, 128)
    p["rb4_l1"] = _make_linear(ks[9], 128, 64)
    p["rb4_l2"] = _make_linear(ks[10], 64, 64)
    p["rb4_sc"] = _make_linear(ks[11], 128, 64)
    p["out"] = _make_linear(ks[12], 64, out_dim0)
    return p


# ---------------------------------------------------------------------------
# One-time host-side preparation (kept OUT of the per-call jit):
# fold emb layer, fuse shortcuts, pack lane-aligned biases, cast to bf16.
# ---------------------------------------------------------------------------
_WEIGHT_ORDER = ("w_in", "w1a", "w2a", "w1bsc", "w2b",
                 "w1c", "w2c", "w1dsc", "w2d", "w_out")


def prepare_resnet_params(params, d_in):
    w_emb, b_emb = params["emb"]
    w_in, b_in = params["input"]
    w_in_x = w_in[:d_in]                         # [D_in, 64]
    w_in_e = w_in[d_in:]                         # [E, 64]
    # No nonlinearity between emb_layer and input_layer -> exact fold.
    w_in_fused = jnp.concatenate([w_in_x, w_emb @ w_in_e], axis=0)   # [D_in+E, 64]
    b_fold = b_emb @ w_in_e + b_in                                   # [64]

    w1a, b1a = params["rb1_l1"]
    w2a, b2a = params["rb1_l2"]
    w1b, b1b = params["rb2_l1"]
    w2b, b2b = params["rb2_l2"]
    wscb, bscb = params["rb2_sc"]
    w1c, b1c = params["rb3_l1"]
    w2c, b2c = params["rb3_l2"]
    w1d, b1d = params["rb4_l1"]
    w2d, b2d = params["rb4_l2"]
    wscd, bscd = params["rb4_sc"]
    w_out, b_out = params["out"]

    # Fuse shortcut with lin1 (same input) into one wider MXU call.
    w1bsc = jnp.concatenate([w1b, wscb], axis=1)      # [64, 256]
    b1bsc = jnp.concatenate([b1b, bscb])
    w1dsc = jnp.concatenate([w1d, wscd], axis=1)      # [128, 128]
    b1dsc = jnp.concatenate([b1d, bscd])

    # Output width: keep unpadded when small (8x less HBM writeback at
    # d_out=16); lane-pad to a multiple of 128 only when wide enough to pay.
    d_out = w_out.shape[1]
    d_out_store = _round_up(d_out, 128) if d_out >= 64 else d_out
    w_out_p = jnp.pad(w_out, ((0, 0), (0, d_out_store - d_out)))
    b_out_p = jnp.pad(b_out, (0, d_out_store - d_out))

    # Lane-aligned 2D bias pack: one row per bias, each row starts at lane 0.
    bias_rows = [b_fold, b1a, b2a, b1bsc, b2b, b1c, b2c, b1dsc, b2d, b_out_p]
    bw = max(256, d_out_store)
    b_packed = jnp.stack(
        [jnp.pad(b, (0, bw - b.shape[0])) for b in bias_rows]
    ).astype(jnp.float32)

    bf = lambda w: w.astype(jnp.bfloat16)
    return {
        "w_in": bf(w_in_fused),
        "w1a": bf(w1a), "w2a": bf(w2a),
        "w1bsc": bf(w1bsc), "w2b": bf(w2b),
        "w1c": bf(w1c), "w2c": bf(w2c),
        "w1dsc": bf(w1dsc), "w2d": bf(w2d),
        "w_out": bf(w_out_p),
        "biases": b_packed,
    }


# ---------------------------------------------------------------------------
# Batch-tile selection
# ---------------------------------------------------------------------------
_TM_MAX = 1024   # big enough to amortize the ~0.35us per-step overhead on all
                 # generations; double-buffered blocks + f32 intermediates stay
                 # well inside v5e's 16 MiB default scoped VMEM.


def _choose_tm(n):
    n16 = _round_up(max(n, 16), 16)          # bf16 sublane packing: >=16 rows
    if n16 <= _TM_MAX:
        return n16                           # single tile covers padded batch
    steps = _cdiv(n16, _TM_MAX)
    if steps % 2:
        steps += 1                           # even step count -> both v7x TCs busy
    return _round_up(_cdiv(n16, steps), 16)


# ---------------------------------------------------------------------------
# Wrapper
# ---------------------------------------------------------------------------
@functools.partial(jax.jit, static_argnames=("emb_size", "d_out"))
def resnet_forward(x, timesteps, prepared, emb_size, d_out):
    n, d_in = x.shape
    temb = timestep_embedding(timesteps, emb_size)
    # Single bf16 input operand [n, d_in + E] (fused with folded input weight).
    xt = jnp.concatenate([x, temb.astype(x.dtype)], axis=-1).astype(jnp.bfloat16)

    weights = tuple(prepared[k] for k in _WEIGHT_ORDER)
    b_packed = prepared["biases"]
    d_out_store = weights[-1].shape[1]

    tm = _choose_tm(n)
    n_pad = _round_up(n, tm)
    if n_pad != n:
        xt = jnp.pad(xt, ((0, n_pad - n), (0, 0)))

    in_specs = [pl.BlockSpec((tm, xt.shape[1]), lambda i: (i, 0)),
                pl.BlockSpec(b_packed.shape, lambda i: (0, 0))]
    in_specs += [pl.BlockSpec(w.shape, lambda i: (0, 0)) for w in weights]

    flops = 2 * n_pad * sum(int(w.shape[0]) * int(w.shape[1]) for w in weights)
    bytes_accessed = int(
        xt.size * 2                                  # bf16 input stream
        + n_pad * d_out_store * 2                    # bf16 output writeback
        + sum(int(w.size) for w in weights) * 2      # resident bf16 weights
        + int(b_packed.size) * 4                     # f32 biases
    )

    out_pad = pl.pallas_call(
        _resnet_kernel,
        out_shape=jax.ShapeDtypeStruct((n_pad, d_out_store), jnp.bfloat16),
        grid_spec=pltpu.PrefetchScalarGridSpec(
            num_scalar_prefetch=0,
            grid=(n_pad // tm,),
            in_specs=in_specs,
            out_specs=pl.BlockSpec((tm, d_out_store), lambda i: (i, 0)),
        ),
        compiler_params=pltpu.CompilerParams(
            dimension_semantics=("parallel",),
        ),
        cost_estimate=pl.CostEstimate(
            flops=flops, transcendentals=0, bytes_accessed=bytes_accessed),
    )(xt, b_packed, *weights)

    # Drop batch padding / unused lanes; return f32 like the PyTorch module.
    return out_pad[:n, :d_out].astype(jnp.float32)


# ---------------------------------------------------------------------------
# Pure-JAX f32 reference (faithful to the PyTorch module) for validation
# ---------------------------------------------------------------------------
def resnet_reference(x, timesteps, params, emb_size):
    def lin(h, wb):
        return h @ wb[0] + wb[1]

    temb = timestep_embedding(timesteps, emb_size)
    emb = lin(temb, params["emb"])
    h = jnp.concatenate([x, emb], axis=-1)      # eval-mode dropout = identity
    h = lin(h, params["input"])

    def resblock(h, l1, l2, sc=None):
        ident = lin(h, params[sc]) if sc is not None else h
        out = jax.nn.relu(lin(h, params[l1]))
        out = lin(out, params[l2])
        return jax.nn.relu(out + ident)

    h = resblock(h, "rb1_l1", "rb1_l2")
    h = resblock(h, "rb2_l1", "rb2_l2", "rb2_sc")
    h = resblock(h, "rb3_l1", "rb3_l2")
    h = resblock(h, "rb4_l1", "rb4_l2", "rb4_sc")
    return lin(h, params["out"])


if __name__ == "__main__":
    # Small shapes: in_dims=[16], out_dims=[16], emb_size=32, batch N=8
    N, D_IN, EMB = 8, 16, 32
    key = jax.random.PRNGKey(0)
    kx, kt, kp = jax.random.split(key, 3)

    x = jax.random.normal(kx, (N, D_IN), jnp.float32)
    timesteps = jax.random.uniform(kt, (N,), jnp.float32, 0.0, 1000.0)
    params = make_params(kp, D_IN, D_IN, EMB)

    prepared = prepare_resnet_params(params, D_IN)   # one-time, outside jit
    out = resnet_forward(x, timesteps, prepared, EMB, D_IN)
    out = jax.block_until_ready(out)

    ref = resnet_reference(x, timesteps, params, EMB)
    assert out.shape == (N, D_IN), out.shape
    max_err = float(jnp.max(jnp.abs(out - ref)))
    # bf16 MXU operands / bf16 output with f32 accumulation -> relaxed tol.
    assert jnp.allclose(out, ref, atol=5e-2, rtol=5e-2), max_err
    print("KERNEL_OK")
</pallas_src>

<mosaic_0001>
module attributes {stable_mosaic.version = 11 : i64} {
  func.func @_resnet_kernel(%arg0: i32, %arg1: memref<16x48xbf16, #tpu.memory_space<vmem>>, %arg2: memref<10x256xf32, #tpu.memory_space<vmem>>, %arg3: memref<48x64xbf16, #tpu.memory_space<vmem>>, %arg4: memref<64x64xbf16, #tpu.memory_space<vmem>>, %arg5: memref<64x64xbf16, #tpu.memory_space<vmem>>, %arg6: memref<64x256xbf16, #tpu.memory_space<vmem>>, %arg7: memref<128x128xbf16, #tpu.memory_space<vmem>>, %arg8: memref<128x128xbf16, #tpu.memory_space<vmem>>, %arg9: memref<128x128xbf16, #tpu.memory_space<vmem>>, %arg10: memref<128x128xbf16, #tpu.memory_space<vmem>>, %arg11: memref<64x64xbf16, #tpu.memory_space<vmem>>, %arg12: memref<64x16xbf16, #tpu.memory_space<vmem>>, %arg13: memref<16x16xbf16, #tpu.memory_space<vmem>>) attributes {dimension_semantics = [#tpu.dimension_semantics<parallel>], iteration_bounds = array<i64: 1>, scalar_prefetch = 0 : i64, scratch_operands = 0 : i64, tpu.core_type = #tpu.core_type<tc>, window_params = [{transform_indices = @transform_0, window_bounds = array<i64: 16, 48>}, {pipeline_mode = #tpu.pipeline_mode<synchronous>, transform_indices = @transform_1, window_bounds = array<i64: 10, 256>}, {pipeline_mode = #tpu.pipeline_mode<synchronous>, transform_indices = @transform_2, window_bounds = array<i64: 48, 64>}, {pipeline_mode = #tpu.pipeline_mode<synchronous>, transform_indices = @transform_3, window_bounds = array<i64: 64, 64>}, {pipeline_mode = #tpu.pipeline_mode<synchronous>, transform_indices = @transform_4, window_bounds = array<i64: 64, 64>}, {pipeline_mode = #tpu.pipeline_mode<synchronous>, transform_indices = @transform_5, window_bounds = array<i64: 64, 256>}, {pipeline_mode = #tpu.pipeline_mode<synchronous>, transform_indices = @transform_6, window_bounds = array<i64: 128, 128>}, {pipeline_mode = #tpu.pipeline_mode<synchronous>, transform_indices = @transform_7, window_bounds = array<i64: 128, 128>}, {pipeline_mode = #tpu.pipeline_mode<synchronous>, transform_indices = @transform_8, window_bounds = array<i64: 128, 128>}, {pipeline_mode = #tpu.pipeline_mode<synchronous>, transform_indices = @transform_9, window_bounds = array<i64: 128, 128>}, {pipeline_mode = #tpu.pipeline_mode<synchronous>, transform_indices = @transform_10, window_bounds = array<i64: 64, 64>}, {pipeline_mode = #tpu.pipeline_mode<synchronous>, transform_indices = @transform_11, window_bounds = array<i64: 64, 16>}, {transform_indices = @transform_12, window_bounds = array<i64: 16, 16>}]} {
    %c0 = arith.constant 0 : index
    %c0_0 = arith.constant 0 : index
    %0 = vector.load %arg2[%c0, %c0_0] : memref<10x256xf32, #tpu.memory_space<vmem>>, vector<10x256xf32>
    %c0_1 = arith.constant 0 : index
    %c0_2 = arith.constant 0 : index
    %1 = vector.load %arg1[%c0_1, %c0_2] : memref<16x48xbf16, #tpu.memory_space<vmem>>, vector<16x48xbf16>
    %c0_3 = arith.constant 0 : index
    %c0_4 = arith.constant 0 : index
    %2 = vector.load %arg3[%c0_3, %c0_4] : memref<48x64xbf16, #tpu.memory_space<vmem>>, vector<48x64xbf16>
    %cst = arith.constant dense<0.000000e+00> : vector<16x64xf32>
    %3 = tpu.matmul %1, %2, %cst {dimension_numbers = #tpu.dot_dimension_numbers<[1], [0], [0], [1], [0, 0, 1, 1], [], []>} : vector<16x48xbf16>, vector<48x64xbf16>, vector<16x64xf32> -> vector<16x64xf32>
    %4 = vector.extract_strided_slice %0 {offsets = [0, 0], sizes = [1, 64], strides = [1, 1]} : vector<10x256xf32> to vector<1x64xf32>
    %5 = vector.broadcast %4 : vector<1x64xf32> to vector<16x64xf32>
    %6 = arith.addf %3, %5 : vector<16x64xf32>
    %7 = arith.truncf %6 : vector<16x64xf32> to vector<16x64xbf16>
    %c0_5 = arith.constant 0 : index
    %c0_6 = arith.constant 0 : index
    %8 = vector.load %arg4[%c0_5, %c0_6] : memref<64x64xbf16, #tpu.memory_space<vmem>>, vector<64x64xbf16>
    %cst_7 = arith.constant dense<0.000000e+00> : vector<16x64xf32>
    %9 = tpu.matmul %7, %8, %cst_7 {dimension_numbers = #tpu.dot_dimension_numbers<[1], [0], [0], [1], [0, 0, 1, 1], [], []>} : vector<16x64xbf16>, vector<64x64xbf16>, vector<16x64xf32> -> vector<16x64xf32>
    %10 = vector.extract_strided_slice %0 {offsets = [1, 0], sizes = [1, 64], strides = [1, 1]} : vector<10x256xf32> to vector<1x64xf32>
    %11 = vector.broadcast %10 : vector<1x64xf32> to vector<16x64xf32>
    %12 = arith.addf %9, %11 : vector<16x64xf32>
    %cst_8 = arith.constant 0.000000e+00 : f32
    %13 = vector.broadcast %cst_8 : f32 to vector<16x64xf32>
    %14 = arith.maximumf %12, %13 : vector<16x64xf32>
    %15 = arith.truncf %14 : vector<16x64xf32> to vector<16x64xbf16>
    %c0_9 = arith.constant 0 : index
    %c0_10 = arith.constant 0 : index
    %16 = vector.load %arg5[%c0_9, %c0_10] : memref<64x64xbf16, #tpu.memory_space<vmem>>, vector<64x64xbf16>
    %cst_11 = arith.constant dense<0.000000e+00> : vector<16x64xf32>
    %17 = tpu.matmul %15, %16, %cst_11 {dimension_numbers = #tpu.dot_dimension_numbers<[1], [0], [0], [1], [0, 0, 1, 1], [], []>} : vector<16x64xbf16>, vector<64x64xbf16>, vector<16x64xf32> -> vector<16x64xf32>
    %18 = vector.extract_strided_slice %0 {offsets = [2, 0], sizes = [1, 64], strides = [1, 1]} : vector<10x256xf32> to vector<1x64xf32>
    %19 = vector.broadcast %18 : vector<1x64xf32> to vector<16x64xf32>
    %20 = arith.addf %17, %19 : vector<16x64xf32>
    %21 = arith.addf %20, %6 : vector<16x64xf32>
    %cst_12 = arith.constant 0.000000e+00 : f32
    %22 = vector.broadcast %cst_12 : f32 to vector<16x64xf32>
    %23 = arith.maximumf %21, %22 : vector<16x64xf32>
    %24 = arith.truncf %23 : vector<16x64xf32> to vector<16x64xbf16>
    %c0_13 = arith.constant 0 : index
    %c0_14 = arith.constant 0 : index
    %25 = vector.load %arg6[%c0_13, %c0_14] : memref<64x256xbf16, #tpu.memory_space<vmem>>, vector<64x256xbf16>
    %cst_15 = arith.constant dense<0.000000e+00> : vector<16x256xf32>
    %26 = tpu.matmul %24, %25, %cst_15 {dimension_numbers = #tpu.dot_dimension_numbers<[1], [0], [0], [1], [0, 0, 1, 1], [], []>} : vector<16x64xbf16>, vector<64x256xbf16>, vector<16x256xf32> -> vector<16x256xf32>
    %27 = vector.extract_strided_slice %0 {offsets = [3, 0], sizes = [1, 256], strides = [1, 1]} : vector<10x256xf32> to vector<1x256xf32>
    %28 = vector.broadcast %27 : vector<1x256xf32> to vector<16x256xf32>
    %29 = arith.addf %26, %28 : vector<16x256xf32>
    %30 = vector.extract_strided_slice %29 {offsets = [0, 0], sizes = [16, 128], strides = [1, 1]} : vector<16x256xf32> to vector<16x128xf32>
    %cst_16 = arith.constant 0.000000e+00 : f32
    %31 = vector.broadcast %cst_16 : f32 to vector<16x128xf32>
    %32 = arith.maximumf %30, %31 : vector<16x128xf32>
    %33 = arith.truncf %32 : vector<16x128xf32> to vector<16x128xbf16>
    %c0_17 = arith.constant 0 : index
    %c0_18 = arith.constant 0 : index
    %34 = vector.load %arg7[%c0_17, %c0_18] : memref<128x128xbf16, #tpu.memory_space<vmem>>, vector<128x128xbf16>
    %cst_19 = arith.constant dense<0.000000e+00> : vector<16x128xf32>
    %35 = tpu.matmul %33, %34, %cst_19 {dimension_numbers = #tpu.dot_dimension_numbers<[1], [0], [0], [1], [0, 0, 1, 1], [], []>} : vector<16x128xbf16>, vector<128x128xbf16>, vector<16x128xf32> -> vector<16x128xf32>
    %36 = vector.extract_strided_slice %0 {offsets = [4, 0], sizes = [1, 128], strides = [1, 1]} : vector<10x256xf32> to vector<1x128xf32>
    %37 = vector.broadcast %36 : vector<1x128xf32> to vector<16x128xf32>
    %38 = arith.addf %35, %37 : vector<16x128xf32>
    %39 = vector.extract_strided_slice %29 {offsets = [0, 128], sizes = [16, 128], strides = [1, 1]} : vector<16x256xf32> to vector<16x128xf32>
    %40 = arith.addf %38, %39 : vector<16x128xf32>
    %cst_20 = arith.constant 0.000000e+00 : f32
    %41 = vector.broadcast %cst_20 : f32 to vector<16x128xf32>
    %42 = arith.maximumf %40, %41 : vector<16x128xf32>
    %43 = arith.truncf %42 : vector<16x128xf32> to vector<16x128xbf16>
    %c0_21 = arith.constant 0 : index
    %c0_22 = arith.constant 0 : index
    %44 = vector.load %arg8[%c0_21, %c0_22] : memref<128x128xbf16, #tpu.memory_space<vmem>>, vector<128x128xbf16>
    %cst_23 = arith.constant dense<0.000000e+00> : vector<16x128xf32>
    %45 = tpu.matmul %43, %44, %cst_23 {dimension_numbers = #tpu.dot_dimension_numbers<[1], [0], [0], [1], [0, 0, 1, 1], [], []>} : vector<16x128xbf16>, vector<128x128xbf16>, vector<16x128xf32> -> vector<16x128xf32>
    %46 = vector.extract_strided_slice %0 {offsets = [5, 0], sizes = [1, 128], strides = [1, 1]} : vector<10x256xf32> to vector<1x128xf32>
    %47 = vector.broadcast %46 : vector<1x128xf32> to vector<16x128xf32>
    %48 = arith.addf %45, %47 : vector<16x128xf32>
    %cst_24 = arith.constant 0.000000e+00 : f32
    %49 = vector.broadcast %cst_24 : f32 to vector<16x128xf32>
    %50 = arith.maximumf %48, %49 : vector<16x128xf32>
    %51 = arith.truncf %50 : vector<16x128xf32> to vector<16x128xbf16>
    %c0_25 = arith.constant 0 : index
    %c0_26 = arith.constant 0 : index
    %52 = vector.load %arg9[%c0_25, %c0_26] : memref<128x128xbf16, #tpu.memory_space<vmem>>, vector<128x128xbf16>
    %cst_27 = arith.constant dense<0.000000e+00> : vector<16x128xf32>
    %53 = tpu.matmul %51, %52, %cst_27 {dimension_numbers = #tpu.dot_dimension_numbers<[1], [0], [0], [1], [0, 0, 1, 1], [], []>} : vector<16x128xbf16>, vector<128x128xbf16>, vector<16x128xf32> -> vector<16x128xf32>
    %54 = vector.extract_strided_slice %0 {offsets = [6, 0], sizes = [1, 128], strides = [1, 1]} : vector<10x256xf32> to vector<1x128xf32>
    %55 = vector.broadcast %54 : vector<1x128xf32> to vector<16x128xf32>
    %56 = arith.addf %53, %55 : vector<16x128xf32>
    %57 = arith.addf %56, %42 : vector<16x128xf32>
    %cst_28 = arith.constant 0.000000e+00 : f32
    %58 = vector.broadcast %cst_28 : f32 to vector<16x128xf32>
    %59 = arith.maximumf %57, %58 : vector<16x128xf32>
    %60 = arith.truncf %59 : vector<16x128xf32> to vector<16x128xbf16>
    %c0_29 = arith.constant 0 : index
    %c0_30 = arith.constant 0 : index
    %61 = vector.load %arg10[%c0_29, %c0_30] : memref<128x128xbf16, #tpu.memory_space<vmem>>, vector<128x128xbf16>
    %cst_31 = arith.constant dense<0.000000e+00> : vector<16x128xf32>
    %62 = tpu.matmul %60, %61, %cst_31 {dimension_numbers = #tpu.dot_dimension_numbers<[1], [0], [0], [1], [0, 0, 1, 1], [], []>} : vector<16x128xbf16>, vector<128x128xbf16>, vector<16x128xf32> -> vector<16x128xf32>
    %63 = vector.extract_strided_slice %0 {offsets = [7, 0], sizes = [1, 128], strides = [1, 1]} : vector<10x256xf32> to vector<1x128xf32>
    %64 = vector.broadcast %63 : vector<1x128xf32> to vector<16x128xf32>
    %65 = arith.addf %62, %64 : vector<16x128xf32>
    %66 = vector.extract_strided_slice %65 {offsets = [0, 0], sizes = [16, 64], strides = [1, 1]} : vector<16x128xf32> to vector<16x64xf32>
    %cst_32 = arith.constant 0.000000e+00 : f32
    %67 = vector.broadcast %cst_32 : f32 to vector<16x64xf32>
    %68 = arith.maximumf %66, %67 : vector<16x64xf32>
    %69 = arith.truncf %68 : vector<16x64xf32> to vector<16x64xbf16>
    %c0_33 = arith.constant 0 : index
    %c0_34 = arith.constant 0 : index
    %70 = vector.load %arg11[%c0_33, %c0_34] : memref<64x64xbf16, #tpu.memory_space<vmem>>, vector<64x64xbf16>
    %cst_35 = arith.constant dense<0.000000e+00> : vector<16x64xf32>
    %71 = tpu.matmul %69, %70, %cst_35 {dimension_numbers = #tpu.dot_dimension_numbers<[1], [0], [0], [1], [0, 0, 1, 1], [], []>} : vector<16x64xbf16>, vector<64x64xbf16>, vector<16x64xf32> -> vector<16x64xf32>
    %72 = vector.extract_strided_slice %0 {offsets = [8, 0], sizes = [1, 64], strides = [1, 1]} : vector<10x256xf32> to vector<1x64xf32>
    %73 = vector.broadcast %72 : vector<1x64xf32> to vector<16x64xf32>
    %74 = arith.addf %71, %73 : vector<16x64xf32>
    %75 = vector.extract_strided_slice %65 {offsets = [0, 64], sizes = [16, 64], strides = [1, 1]} : vector<16x128xf32> to vector<16x64xf32>
    %76 = arith.addf %74, %75 : vector<16x64xf32>
    %cst_36 = arith.constant 0.000000e+00 : f32
    %77 = vector.broadcast %cst_36 : f32 to vector<16x64xf32>
    %78 = arith.maximumf %76, %77 : vector<16x64xf32>
    %79 = arith.truncf %78 : vector<16x64xf32> to vector<16x64xbf16>
    %c0_37 = arith.constant 0 : index
    %c0_38 = arith.constant 0 : index
    %80 = vector.load %arg12[%c0_37, %c0_38] : memref<64x16xbf16, #tpu.memory_space<vmem>>, vector<64x16xbf16>
    %cst_39 = arith.constant dense<0.000000e+00> : vector<16x16xf32>
    %81 = tpu.matmul %79, %80, %cst_39 {dimension_numbers = #tpu.dot_dimension_numbers<[1], [0], [0], [1], [0, 0, 1, 1], [], []>} : vector<16x64xbf16>, vector<64x16xbf16>, vector<16x16xf32> -> vector<16x16xf32>
    %82 = vector.extract_strided_slice %0 {offsets = [9, 0], sizes = [1, 16], strides = [1, 1]} : vector<10x256xf32> to vector<1x16xf32>
    %83 = vector.broadcast %82 : vector<1x16xf32> to vector<16x16xf32>
    %84 = arith.addf %81, %83 : vector<16x16xf32>
    %85 = arith.truncf %84 : vector<16x16xf32> to vector<16x16xbf16>
    %c0_40 = arith.constant 0 : index
    %c0_41 = arith.constant 0 : index
    %86 = vector.load %arg13[%c0_40, %c0_41] : memref<16x16xbf16, #tpu.memory_space<vmem>>, vector<16x16xbf16>
    tpu.vector_store %arg13[%c0_40, %c0_41], %85 {strides = array<i32>} : memref<16x16xbf16, #tpu.memory_space<vmem>>, vector<16x16xbf16>,
    return
  }
  func.func @transform_0(%arg0: i32) -> (i32, i32) {
    %c0_i32 = arith.constant 0 : i32
    %c0_i32_0 = arith.constant 0 : i32
    return %arg0, %c0_i32 : i32, i32
  }
  func.func @transform_1(%arg0: i32) -> (i32, i32) {
    %c0_i32 = arith.constant 0 : i32
    %c0_i32_0 = arith.constant 0 : i32
    %c0_i32_1 = arith.constant 0 : i32
    return %c0_i32, %c0_i32_0 : i32, i32
  }
  func.func @transform_2(%arg0: i32) -> (i32, i32) {
    %c0_i32 = arith.constant 0 : i32
    %c0_i32_0 = arith.constant 0 : i32
    %c0_i32_1 = arith.constant 0 : i32
    return %c0_i32, %c0_i32_0 : i32, i32
  }
  func.func @transform_3(%arg0: i32) -> (i32, i32) {
    %c0_i32 = arith.constant 0 : i32
    %c0_i32_0 = arith.constant 0 : i32
    %c0_i32_1 = arith.constant 0 : i32
    return %c0_i32, %c0_i32_0 : i32, i32
  }
  func.func @transform_4(%arg0: i32) -> (i32, i32) {
    %c0_i32 = arith.constant 0 : i32
    %c0_i32_0 = arith.constant 0 : i32
    %c0_i32_1 = arith.constant 0 : i32
    return %c0_i32, %c0_i32_0 : i32, i32
  }
  func.func @transform_5(%arg0: i32) -> (i32, i32) {
    %c0_i32 = arith.constant 0 : i32
    %c0_i32_0 = arith.constant 0 : i32
    %c0_i32_1 = arith.constant 0 : i32
    return %c0_i32, %c0_i32_0 : i32, i32
  }
  func.func @transform_6(%arg0: i32) -> (i32, i32) {
    %c0_i32 = arith.constant 0 : i32
    %c0_i32_0 = arith.constant 0 : i32
    %c0_i32_1 = arith.constant 0 : i32
    return %c0_i32, %c0_i32_0 : i32, i32
  }
  func.func @transform_7(%arg0: i32) -> (i32, i32) {
    %c0_i32 = arith.constant 0 : i32
    %c0_i32_0 = arith.constant 0 : i32
    %c0_i32_1 = arith.constant 0 : i32
    return %c0_i32, %c0_i32_0 : i32, i32
  }
  func.func @transform_8(%arg0: i32) -> (i32, i32) {
    %c0_i32 = arith.constant 0 : i32
    %c0_i32_0 = arith.constant 0 : i32
    %c0_i32_1 = arith.constant 0 : i32
    return %c0_i32, %c0_i32_0 : i32, i32
  }
  func.func @transform_9(%arg0: i32) -> (i32, i32) {
    %c0_i32 = arith.constant 0 : i32
    %c0_i32_0 = arith.constant 0 : i32
    %c0_i32_1 = arith.constant 0 : i32
    return %c0_i32, %c0_i32_0 : i32, i32
  }
  func.func @transform_10(%arg0: i32) -> (i32, i32) {
    %c0_i32 = arith.constant 0 : i32
    %c0_i32_0 = arith.constant 0 : i32
    %c0_i32_1 = arith.constant 0 : i32
    return %c0_i32, %c0_i32_0 : i32, i32
  }
  func.func @transform_11(%arg0: i32) -> (i32, i32) {
    %c0_i32 = arith.constant 0 : i32
    %c0_i32_0 = arith.constant 0 : i32
    %c0_i32_1 = arith.constant 0 : i32
    return %c0_i32, %c0_i32_0 : i32, i32
  }
  func.func @transform_12(%arg0: i32) -> (i32, i32) {
    %c0_i32 = arith.constant 0 : i32
    %c0_i32_0 = arith.constant 0 : i32
    return %arg0, %c0_i32 : i32, i32
  }
}

</mosaic_0001>

<bundles_post_ra>
// kernel: resnet_forward.1
= control target key start
LH: loop header
LB: loop body
LE: loop exit
PB: predicated region body
PF: predicated region fallthrough
CT: control target
= control target key end

     0   :  { %17 = vsyncpa [#allocation3], 0  ;;  %s1971_s0 = inlined_call_operand.vmem [shape: bf16[16,48], index: 0, kind: input, shape index: {}]   ;;  %s1972_s1 = inlined_call_operand.hbm [shape: f32[10,256], index: 1, kind: input, shape index: {}]   ;;  %s1973_s2 = inlined_call_operand.hbm [shape: bf16[48,64], index: 2, kind: input, shape index: {}]   ;;  %s1974_s3 = inlined_call_operand.hbm [shape: bf16[64,64], index: 3, kind: input, shape index: {}]   ;;  %s1975_s4 = inlined_call_operand.vmem [shape: bf16[64,64], index: 4, kind: input, shape index: {}]   ;;  %s1976_s5 = inlined_call_operand.vmem [shape: bf16[64,256], index: 5, kind: input, shape index: {}]   ;;  %s1977_s6 = inlined_call_operand.hbm [shape: bf16[128,128], index: 6, kind: input, shape index: {}]   ;;  %s1978_s7 = inlined_call_operand.hbm [shape: bf16[128,128], index: 7, kind: input, shape index: {}]   ;;  %s1979_s8 = inlined_call_operand.hbm [shape: bf16[128,128], index: 8, kind: input, shape index: {}]   ;;  %s1980_s9 = inlined_call_operand.hbm [shape: bf16[128,128], index: 9, kind: input, shape index: {}]   ;;  %s1981_s10 = inlined_call_operand.hbm [shape: bf16[64,64], index: 10, kind: input, shape index: {}]   ;;  %s1982_s11 = inlined_call_operand.vmem [shape: bf16[64,16], index: 11, kind: input, shape index: {}]   ;;  %s1983_s12 = inlined_call_operand.vmem [shape: bf16[16,16], index: 12, kind: output, shape index: {}]  }
   0x1   :  { %18 = vsyncpa [#allocation5], 0 }
   0x2   :  { %19 = vsyncpa [#allocation8], 0 }
   0x3   :  { %20 = vsyncpa [#allocation11], 0 }
   0x4   :  { %21 = vsyncpa [#allocation14], 0  ;;  %s1671_s21 = smov [#allocation4]  }
   0x5   :  { %s41_s22 = sshll.u32 %s1671_s21, 4  ;;  %s42_s22 = int_to_ptr.vmem [resolvable:$true] %s41_s22 }
   0x6   :  { %s1509_s23 = scalar_lea.vmem %s42_s22, 384  ;;  %p1514_p1 = scmp.lt.s32.totalorder %s42_s22, %s42_s22 }
   0x7   :  { %p1510_p0 = scmp.ne.s32.totalorder %s42_s22, %s1509_s23  ;;  %p1515_p2 = scmp.lt.s32.totalorder %s1509_s23, %s1509_s23 }
   0x9   :  { %p1516_p3 = por %p1515_p2, %p1514_p1 }
   0xb   :  { %p1517_p4 = pnand %p1516_p3, %p1510_p0 }
   0xd   :  { %1520 = shalt.err (!%p1517_p4)
}
   0xe   :  { %s1672_s24 = smov 64   ;;  %s1673_s25 = smov 4  }
   0xf   :  { %47 = dma.hbm_to_vmem [thread:$0]  %s1973_s2, 384, %s42_s22, [#allocation5], %s1672_s24, %s1672_s24, %s1673_s25  }
  0x10   :  { %s1674_s28 = smov [#allocation7]   ;;  %s1675_s30 = smov [#allocation10]  }
  0x11   :  { %s69_s29 = sshll.u32 %s1674_s28, 4  ;;  %s93_s13 = sshll.u32 %s1675_s30, 4  ;;  %s70_s29 = int_to_ptr.vmem [resolvable:$true] %s69_s29  ;;  %s94_s13 = int_to_ptr.vmem [resolvable:$true] %s93_s13 }
  0x12   :  { %s1529_s14 = scalar_lea.vmem %s70_s29, 1024  ;;  %p1534_p6 = scmp.lt.s32.totalorder %s70_s29, %s70_s29 }
  0x13   :  { %p1530_p5 = scmp.ne.s32.totalorder %s70_s29, %s1529_s14  ;;  %p1535_p7 = scmp.lt.s32.totalorder %s1529_s14, %s1529_s14 }
  0x15   :  { %p1536_p8 = por %p1535_p7, %p1534_p6 }
  0x17   :  { %p1537_p9 = pnand %p1536_p8, %p1530_p5 }
  0x19   :  { %1540 = shalt.err (!%p1537_p9)
}
  0x1a   :  { %75 = dma.hbm_to_vmem [thread:$0]  %s1977_s6, 1024, %s70_s29, [#allocation8], %s1672_s24, %s1672_s24, %s1673_s25  }
  0x1b   :  { %s1549_s2 = scalar_lea.vmem %s94_s13, 1024  ;;  %p1554_p11 = scmp.lt.s32.totalorder %s94_s13, %s94_s13 }
  0x1c   :  { %p1550_p10 = scmp.ne.s32.totalorder %s94_s13, %s1549_s2  ;;  %p1555_p12 = scmp.lt.s32.totalorder %s1549_s2, %s1549_s2 }
  0x1e   :  { %p1556_p13 = por %p1555_p12, %p1554_p11 }
  0x20   :  { %p1557_p0 = pnand %p1556_p13, %p1550_p10 }
  0x22   :  { %1560 = shalt.err (!%p1557_p0)
}
  0x23   :  { %99 = dma.hbm_to_vmem [thread:$0]  %s1979_s8, 1024, %s94_s13, [#allocation11], %s1672_s24, %s1672_s24, %s1673_s25  }
  0x24   :  { %s1676_s19 = smov [#allocation2]  }
  0x25   :  { %s29_s20 = sshll.u32 %s1676_s19, 4  ;;  %s30_s20 = int_to_ptr.vmem [resolvable:$true] %s29_s20 }
  0x26   :  { %s1569_s21 = scalar_lea.vmem %s30_s20, 512  ;;  %p1574_p2 = scmp.lt.s32.totalorder %s30_s20, %s30_s20 }
  0x27   :  { %p1570_p1 = scmp.ne.s32.totalorder %s30_s20, %s1569_s21  ;;  %p1575_p3 = scmp.lt.s32.totalorder %s1569_s21, %s1569_s21 }
  0x29   :  { %p1576_p4 = por %p1575_p3, %p1574_p2 }
  0x2b   :  { %p1577_p5 = pnand %p1576_p4, %p1570_p1 }
  0x2d   :  { %1580 = shalt.err (!%p1577_p5)
}
  0x2e   :  { %s1677_s6 = smov 256   ;;  %s1678_s22 = smov 16  }
  0x2f   :  { %35 = dma.hbm_to_vmem [thread:$0]  %s1972_s1, 512, %s30_s20, [#allocation3], %s1677_s6, %s1677_s6, %s1678_s22  }
  0x30   :  { %s1679_s27 = smov [#allocation6]   ;;  %s1680_s29 = smov [#allocation9]  }
  0x31   :  { %s53_s28 = sshll.u32 %s1679_s27, 4  ;;  %s81_s8 = sshll.u32 %s1680_s29, 4  ;;  %s54_s28 = int_to_ptr.vmem [resolvable:$true] %s53_s28  ;;  %s82_s8 = int_to_ptr.vmem [resolvable:$true] %s81_s8 }
  0x32   :  { %s1589_s30 = scalar_lea.vmem %s54_s28, 512  ;;  %p1594_p7 = scmp.lt.s32.totalorder %s54_s28, %s54_s28 }
  0x33   :  { %p1590_p6 = scmp.ne.s32.totalorder %s54_s28, %s1589_s30  ;;  %p1595_p8 = scmp.lt.s32.totalorder %s1589_s30, %s1589_s30 }
  0x35   :  { %p1596_p9 = por %p1595_p8, %p1594_p7 }
  0x37   :  { %p1597_p10 = pnand %p1596_p9, %p1590_p6 }
  0x39   :  { %1600 = shalt.err (!%p1597_p10)
}
  0x3a   :  { %59 = dma.hbm_to_vmem [thread:$0]  %s1974_s3, 512, %s54_s28, [#allocation5], %s1672_s24, %s1672_s24, %s1673_s25  }
  0x3b   :  { %s1609_s1 = scalar_lea.vmem %s82_s8, 1024  ;;  %p1614_p12 = scmp.lt.s32.totalorder %s82_s8, %s82_s8 }
  0x3c   :  { %p1610_p11 = scmp.ne.s32.totalorder %s82_s8, %s1609_s1  ;;  %p1615_p13 = scmp.lt.s32.totalorder %s1609_s1, %s1609_s1 }
  0x3e   :  { %p1616_p0 = por %p1615_p13, %p1614_p12 }
  0x40   :  { %p1617_p1 = pnand %p1616_p0, %p1610_p11 }
  0x42   :  { %1620 = shalt.err (!%p1617_p1)
}
  0x43   :  { %87 = dma.hbm_to_vmem [thread:$0]  %s1978_s7, 1024, %s82_s8, [#allocation8], %s1672_s24, %s1672_s24, %s1673_s25  }
  0x44   :  { %s1681_s2 = smov [#allocation12]   ;;  %s1682_s18 = smov [#allocation13]  }
  0x45   :  { %s105_s17 = sshll.u32 %s1681_s2, 4  ;;  %s117_s19 = sshll.u32 %s1682_s18, 4  ;;  %s106_s17 = int_to_ptr.vmem [resolvable:$true] %s105_s17  ;;  %s118_s19 = int_to_ptr.vmem [resolvable:$true] %s117_s19 }
  0x46   :  { %s1629_s3 = scalar_lea.vmem %s106_s17, 1024  ;;  %p1634_p3 = scmp.lt.s32.totalorder %s106_s17, %s106_s17 }
  0x47   :  { %p1630_p2 = scmp.ne.s32.totalorder %s106_s17, %s1629_s3  ;;  %p1635_p4 = scmp.lt.s32.totalorder %s1629_s3, %s1629_s3 }
  0x49   :  { %p1636_p5 = por %p1635_p4, %p1634_p3 }
  0x4b   :  { %p1637_p6 = pnand %p1636_p5, %p1630_p2 }
  0x4d   :  { %1640 = shalt.err (!%p1637_p6)
}
  0x4e   :  { %111 = dma.hbm_to_vmem [thread:$0]  %s1980_s9, 1024, %s106_s17, [#allocation11], %s1672_s24, %s1672_s24, %s1673_s25  }
  0x4f   :  { %s1649_s7 = scalar_lea.vmem %s118_s19, 512  ;;  %p1654_p8 = scmp.lt.s32.totalorder %s118_s19, %s118_s19 }
  0x50   :  { %p1650_p7 = scmp.ne.s32.totalorder %s118_s19, %s1649_s7  ;;  %p1655_p9 = scmp.lt.s32.totalorder %s1649_s7, %s1649_s7 }
  0x52   :  { %p1656_p10 = por %p1655_p9, %p1654_p8 }
  0x54   :  { %p1657_p11 = pnand %p1656_p10, %p1650_p7 }
  0x56   :  { %1660 = shalt.err (!%p1657_p11)
}
  0x57   :  { %123 = dma.hbm_to_vmem [thread:$0]  %s1981_s10, 512, %s118_s19, [#allocation14], %s1672_s24, %s1672_s24, %s1673_s25  }
  0x58   :  { %1661 = dma.done.wait [#allocation3], 512  }
  0x59   :  { %1662 = vsyncadd [#allocation3], 4294966784 }
  0x5a   :  { %1663 = dma.done.wait [#allocation5], 896  }
  0x5b   :  { %1664 = vsyncadd [#allocation5], 4294966400 }
  0x5c   :  { %1665 = dma.done.wait [#allocation8], 2048  }
  0x5d   :  { %1666 = vsyncadd [#allocation8], 4294965248 }
  0x5e   :  { %1667 = dma.done.wait [#allocation11], 2048  }
  0x5f   :  { %1668 = vsyncadd [#allocation11], 4294965248 }
  0x60   :  { %1669 = dma.done.wait [#allocation14], 512  }
  0x61   :  { %1670 = vsyncadd [#allocation14], 4294966784  ;;  %v1683_v0 = vmov 0.0   ;;  %vm1684_vm0 = vmmov 0   ;;  %v1437_v1 = vld [vmem:[#allocation4 + $0x10] sm:$0xff]   ;;  %v1438_v2 = vld [vmem:[#allocation4 + $0x8] sm:$0xff]   ;;  %v162_v10 = vlaneseq }
  0x62   :  { %1284 = vmatprep.subr.bf16.mxu0 %v1683_v0  ;;  %1290 = vmatprep.mubr.msk.bf16.mxu0 %vm1684_vm0, %v1683_v0  ;;  %v1441_v3 = vld [vmem:[#allocation6 + $0x18] sm:$0xff]   ;;  %v1439_v4 = vld [vmem:[#allocation4] sm:$0xff]   ;;  %v1442_v5 = vld [vmem:[#allocation6 + $0x10] sm:$0xff]   ;;  %vm189_vm1 = vcmask 392192   ;;  %vm271_vm2 = vcmask 523264   ;;  %v1685_v44 = vmov 0  }
  0x63   :  { %1294 = vmatprep.subr.bf16.mxu1 %v1683_v0  ;;  %1302 = vmatprep.mubr.msk.bf16.mxu1 %vm1684_vm0, %v1683_v0  ;;  %v1440_v6 = vld [vmem:[%s1971_s0] sm:$0xff]   ;;  %v1444_v8 = vld [vmem:[#allocation6] sm:$0xff]   ;;  %v1817_v11 = vshrl.u32 %v162_v10, 7  ;;  %v1446_v22 = vld [vmem:[%s1975_s4 + $0x10] sm:$0xff]   ;;  %vm1142_vm3 = vcmask 125952  }
  0x64   :  { %1285 = vmatpush3.bf16.msra.mxu0 %v1437_v1  ;;  %1295 = vmatpush3.bf16.msra.mxu1 %v1441_v3  ;;  %v1443_v7 = vld [vmem:[#allocation6 + $0x8] sm:$0xff]   ;;  %v1445_v9 = vld [vmem:[%s1975_s4 + $0x18] sm:$0xff]   ;;  %v1447_v23 = vld [vmem:[%s1975_s4 + $0x8] sm:$0xff]  }
  0x65   :  { %1286 = vmatprep.subr.bf16.mxu0 %v1683_v0  ;;  %1296 = vmatprep.subr.bf16.mxu1 %v1683_v0  ;;  %v164_v12 = vsub.s32 0, %v1817_v11  ;;  %v1820_v13 = vld [vmem:[#allocation2] sm:$0xff]  ;;  %v1449_v25 = vld [vmem:[%s1976_s5 + $0x30] ss:$8 sps:$4 sm:$0xff]   ;;  %v1451_v26 = vld [vmem:[%s1976_s5 + $0x34] ss:$8 sps:$4 sm:$0xff]  }
  0x66   :  { %v1448_v24 = vld [vmem:[%s1975_s4] sm:$0xff]   ;;  %v245_v27 = vsub.s32 1, %v1817_v11  ;;  %v1457_v40 = vld [vmem:[%s1976_s5 + $0x14] ss:$8 sps:$4 sm:$0xff]   ;;  %v1455_v41 = vld [vmem:[%s1976_s5 + $0x10] ss:$8 sps:$4 sm:$0xff]  }
  0x67   :  { %v165_v15 = vrot.slane %v1820_v13, %v164_v12  ;;  %v1454_v38 = vld [vmem:[%s1976_s5 + $0x24] ss:$8 sps:$4 sm:$0xff]   ;;  %v1452_v39 = vld [vmem:[%s1976_s5 + $0x20] ss:$8 sps:$4 sm:$0xff]   ;;  %v1461_v45 = vld [vmem:[#allocation7 + $0x38] sm:$0xff]   ;;  %v329_v50 = vsub.s32 2, %v1817_v11 }
  0x68   :  { %1287 = vmatpush3.bf16.msra.mxu0 %v1438_v2  ;;  %1297 = vmatpush3.bf16.msra.mxu1 %v1442_v5  ;;  %v246_v28 = vrot.slane %v1820_v13, %v245_v27  ;;  %v1460_v42 = vld [vmem:[%s1976_s5 + $0x4] ss:$8 sps:$4 sm:$0xff]   ;;  %v1458_v43 = vld [vmem:[%s1976_s5] ss:$8 sps:$4 sm:$0xff]   ;;  %v1464_v48 = vld [vmem:[#allocation7 + $0x20] sm:$0xff]  }
  0x69   :  { %1288 = vmatprep.subr.bf16.mxu0 %v1683_v0  ;;  %1298 = vmatprep.subr.bf16.mxu1 %v1683_v0  ;;  %v1462_v46 = vld [vmem:[#allocation7 + $0x30] sm:$0xff]   ;;  %v1463_v47 = vld [vmem:[#allocation7 + $0x28] sm:$0xff]   ;;  %v1465_v49 = vld [vmem:[#allocation7 + $0x18] sm:$0xff]   ;;  %v330_v51 = vrot.slane %v1820_v13, %v329_v50 }
  0x6a   :  { %v1466_v63 = vld [vmem:[#allocation7 + $0x10] sm:$0xff]   ;;  %v1467_v1 = vld [vmem:[#allocation7 + $0x8] sm:$0xff]   ;;  %v1468_v2 = vld [vmem:[#allocation7] sm:$0xff]  }
  0x6b   :  { %v1469_v3 = vld [vmem:[#allocation9 + $0x38] sm:$0xff]   ;;  %v1471_v5 = vld [vmem:[#allocation9 + $0x28] sm:$0xff]   ;;  %v1484_v50 = vld [vmem:[#allocation10] sm:$0xff]  }
  0x6c   :  { %1289 = vmatpush3.bf16.msra.mxu0 %v1439_v4  ;;  %1299 = vmatpush3.bf16.msra.mxu1 %v1443_v7  ;;  %v1470_v4 = vld [vmem:[#allocation9 + $0x30] sm:$0xff]   ;;  %v1473_v7 = vld [vmem:[#allocation9 + $0x18] sm:$0xff]  }
  0x6d   :  { %1306 = vmatprep.subr.bf16.mxu0 %v1683_v0  ;;  %1300 = vmatprep.subr.bf16.mxu1 %v1683_v0 }
  0x6f   :  { %1291 = vmatmul.mubr.msk.bf16.vlgmr.msra.gmra.mxu0 %vm189_vm1, %v1440_v6  ;;  %v1472_v6 = vld [vmem:[#allocation9 + $0x20] sm:$0xff]  }
  0x70   :  { %1314 = vmatprep.mubr.msk.bf16.mxu0 %vm1684_vm0, %v1683_v0  ;;  %1301 = vmatpush3.bf16.msra.mxu1 %v1444_v8  ;;  %v414_v8 = vsub.s32 3, %v1817_v11 }
  0x71   :  { %1307 = vmatpush3.bf16.msra.mxu0 %v1445_v9  ;;  %471 = vmatprep.subr.bf16.mxu1 %v1451_v26  ;;  %v1479_v26 = vld [vmem:[#allocation10 + $0x28] sm:$0xff]  }
  0x72   :  { %1308 = vmatprep.subr.bf16.mxu0 %v1683_v0  ;;  %v415_v9 = vrot.slane %v1820_v13, %v414_v8 }
  0x75   :  { %1309 = vmatpush3.bf16.msra.mxu0 %v1446_v22  ;;  %v1475_v22 = vld [vmem:[#allocation9 + $0x8] sm:$0xff]  }
  0x76   :  { %1310 = vmatprep.subr.bf16.mxu0 %v1683_v0 }
  0x79   :  { %1311 = vmatpush3.bf16.msra.mxu0 %v1447_v23  ;;  %v1476_v23 = vld [vmem:[#allocation9] sm:$0xff]  }
  0x7a   :  { %1312 = vmatprep.subr.bf16.mxu0 %v1683_v0 }
  0x7d   :  { %1313 = vmatpush3.bf16.msra.mxu0 %v1448_v24  ;;  %v1477_v24 = vld [vmem:[#allocation10 + $0x38] sm:$0xff]  }
  0x7e   :  { %1318 = vmatprep.subr.bf16.mxu0 %v1683_v0 }
 0x12f   :  { %v227_v14 = vpop.f32.mrf.mxu0 }
 0x130   :  { %v1825_v18 = vadd.f32 %v227_v14, %v165_v15 }
 0x131   :  { %v1292_v16 = vpop.f32.mrf.mxu0 }
 0x133   :  { %v230_v17 = vpop.f32.mrf.mxu0 }
 0x134   :  { %v1827_v19 = vadd.f32 %v230_v17, %v165_v15 }
 0x135   :  { %v1293_v20 = vpop.f32.mrf.mxu0 }
 0x136   :  { %v234_v21 = vpack.c.bf16 %v1827_v19, %v1825_v18 }
 0x138   :  { %1303 = vmatmul.mubr.msk.bf16.vlgmr.msra.gmra.mxu1 %vm271_vm2, %v234_v21  ;;  %v1474_v21 = vld [vmem:[#allocation9 + $0x10] sm:$0xff]  }
 0x139   :  { %472 = vmatpush1.bf16.msra.mxu1 %v1449_v25  ;;  %495 = vmatprep.mubr.bf16.mxu1 %v1685_v44  ;;  %v1478_v25 = vld [vmem:[#allocation10 + $0x30] sm:$0xff]  }
 0x13a   :  { %473 = vmatprep.subr.bf16.mxu1 %v1454_v38 }
 0x13d   :  { %474 = vmatpush1.bf16.msra.mxu1 %v1452_v39 }
 0x13e   :  { %475 = vmatprep.subr.bf16.mxu1 %v1457_v40 }
 0x141   :  { %476 = vmatpush1.bf16.msra.mxu1 %v1455_v41 }
 0x142   :  { %477 = vmatprep.subr.bf16.mxu1 %v1460_v42 }
 0x145   :  { %478 = vmatpush1.bf16.msra.mxu1 %v1458_v43 }
 0x146   :  { %1338 = vmatprep.subr.bf16.mxu1 %v1683_v0 }
 0x1f8   :  { %v309_v29 = vpop.f32.mrf.mxu1 }
 0x1f9   :  { %v310_v31 = vadd.f32 %v309_v29, %v246_v28  ;;  %v1481_v29 = vld [vmem:[#allocation10 + $0x18] sm:$0xff]  }
 0x1fa   :  { %v1304_v30 = vpop.f32.mrf.mxu1 }
 0x1fb   :  { %v316_v35 = vmax.f32 %v310_v31, 0.0  ;;  %v527_v30 = vsub.s32 4, %v1817_v11  ;;  %v152_v31 = vld [vmem:[#allocation2 + $0x8] sm:$0xff] }
 0x1fc   :  { %v312_v32 = vpop.f32.mrf.mxu1 }
 0x1fd   :  { %v313_v33 = vadd.f32 %v312_v32, %v246_v28  ;;  %v1480_v28 = vld [vmem:[#allocation10 + $0x20] sm:$0xff]   ;;  %v528_v32 = vrot.slane %v1820_v13, %v527_v30 }
 0x1fe   :  { %v1305_v34 = vpop.f32.mrf.mxu1 }
 0x1ff   :  { %v317_v36 = vmax.f32 %v313_v33, 0.0  ;;  %v419_v33 = vrot.slane %v152_v31, %v414_v8  ;;  %v753_v8 = vsub.s32 6, %v1817_v11 }
 0x201   :  { %v318_v37 = vpack.c.bf16 %v317_v36, %v316_v35 }
 0x203   :  { %1315 = vmatmul.mubr.msk.bf16.vlgmr.msra.gmra.mxu0 %vm271_vm2, %v318_v37 }
 0x204   :  { %1334 = vmatprep.mubr.msk.bf16.mxu0 %vm1684_vm0, %v1683_v0  ;;  %1319 = vmatpush3.bf16.msra.mxu0 %v1461_v45 }
 0x205   :  { %1320 = vmatprep.subr.bf16.mxu0 %v1683_v0 }
 0x208   :  { %1321 = vmatpush3.bf16.msra.mxu0 %v1462_v46 }
 0x209   :  { %1322 = vmatprep.subr.bf16.mxu0 %v1683_v0 }
 0x20c   :  { %1323 = vmatpush3.bf16.msra.mxu0 %v1463_v47 }
 0x20d   :  { %1324 = vmatprep.subr.bf16.mxu0 %v1683_v0 }
 0x210   :  { %1325 = vmatpush3.bf16.msra.mxu0 %v1464_v48  ;;  %v1482_v48 = vld [vmem:[#allocation10 + $0x10] sm:$0xff]  }
 0x211   :  { %1326 = vmatprep.subr.bf16.mxu0 %v1683_v0 }
 0x214   :  { %1327 = vmatpush3.bf16.msra.mxu0 %v1465_v49  ;;  %v1483_v49 = vld [vmem:[#allocation10 + $0x8] sm:$0xff]  }
 0x215   :  { %1328 = vmatprep.subr.bf16.mxu0 %v1683_v0 }
 0x218   :  { %1329 = vmatpush3.bf16.msra.mxu0 %v1466_v63 }
 0x219   :  { %1330 = vmatprep.subr.bf16.mxu0 %v1683_v0 }
 0x21c   :  { %1331 = vmatpush3.bf16.msra.mxu0 %v1467_v1 }
 0x21d   :  { %1332 = vmatprep.subr.bf16.mxu0 %v1683_v0 }
 0x220   :  { %1333 = vmatpush3.bf16.msra.mxu0 %v1468_v2 }
 0x221   :  { %1358 = vmatprep.subr.bf16.mxu0 %v1683_v0 }
 0x2c3   :  { %v392_v52 = vpop.f32.mrf.mxu0 }
 0x2c4   :  { %v393_v53 = vadd.f32 %v392_v52, %v330_v51  ;;  %v1486_v52 = vld [vmem:[#allocation12 + $0x30] sm:$0xff]  }
 0x2c5   :  { %v1316_v54 = vpop.f32.mrf.mxu0 }
 0x2c6   :  { %v399_v56 = vadd.f32 %v393_v53, %v1825_v18  ;;  %v1487_v53 = vld [vmem:[#allocation12 + $0x28] sm:$0xff]   ;;  %v1488_v54 = vld [vmem:[#allocation12 + $0x20] sm:$0xff]  }
 0x2c7   :  { %v395_v55 = vpop.f32.mrf.mxu0 }
 0x2c8   :  { %v396_v57 = vadd.f32 %v395_v55, %v330_v51  ;;  %v401_v60 = vmax.f32 %v399_v56, 0.0  ;;  %v1485_v51 = vld [vmem:[#allocation12 + $0x38] sm:$0xff]   ;;  %v641_v56 = vsub.s32 5, %v1817_v11 }
 0x2c9   :  { %v1317_v58 = vpop.f32.mrf.mxu0  ;;  %v1489_v55 = vld [vmem:[#allocation12 + $0x18] sm:$0xff]  }
 0x2ca   :  { %v400_v59 = vadd.f32 %v396_v57, %v1827_v19  ;;  %v642_v57 = vrot.slane %v1820_v13, %v641_v56 }
 0x2cc   :  { %v402_v61 = vmax.f32 %v400_v59, 0.0 }
 0x2ce   :  { %v403_v62 = vpack.c.bf16 %v402_v61, %v401_v60 }
 0x2d0   :  { %1177 = vmatmul.mubr.msk.bf16.vlgmr.msra.gmra.mxu1 %vm271_vm2, %v403_v62 }
 0x2d1   :  { %1354 = vmatprep.mubr.msk.bf16.mxu1 %vm1684_vm0, %v1683_v0  ;;  %1339 = vmatpush3.bf16.msra.mxu1 %v1469_v3 }
 0x2d2   :  { %1340 = vmatprep.subr.bf16.mxu1 %v1683_v0 }
 0x2d5   :  { %1341 = vmatpush3.bf16.msra.mxu1 %v1470_v4  ;;  %v1490_v4 = vld [vmem:[#allocation12 + $0x10] sm:$0xff]  }
 0x2d6   :  { %1342 = vmatprep.subr.bf16.mxu1 %v1683_v0 }
 0x2d9   :  { %1343 = vmatpush3.bf16.msra.mxu1 %v1471_v5  ;;  %v1491_v5 = vld [vmem:[#allocation12 + $0x8] sm:$0xff]  }
 0x2da   :  { %1344 = vmatprep.subr.bf16.mxu1 %v1683_v0 }
 0x2dd   :  { %1345 = vmatpush3.bf16.msra.mxu1 %v1472_v6  ;;  %v1492_v6 = vld [vmem:[#allocation12] sm:$0xff]  }
 0x2de   :  { %1346 = vmatprep.subr.bf16.mxu1 %v1683_v0 }
 0x2e1   :  { %1347 = vmatpush3.bf16.msra.mxu1 %v1473_v7  ;;  %v1493_v7 = vld [vmem:[#allocation13 + $0x18] sm:$0xff]  }
 0x2e2   :  { %1348 = vmatprep.subr.bf16.mxu1 %v1683_v0 }
 0x2e5   :  { %1349 = vmatpush3.bf16.msra.mxu1 %v1474_v21 }
 0x2e6   :  { %1350 = vmatprep.subr.bf16.mxu1 %v1683_v0 }
 0x2e9   :  { %1351 = vmatpush3.bf16.msra.mxu1 %v1475_v22 }
 0x2ea   :  { %1352 = vmatprep.subr.bf16.mxu1 %v1683_v0 }
 0x2ed   :  { %1353 = vmatpush3.bf16.msra.mxu1 %v1476_v23 }
 0x2ee   :  { %1378 = vmatprep.subr.bf16.mxu1 %v1683_v0 }
 0x390   :  { %v497_v10 = vpop.f32.mrf.mxu1 }
 0x391   :  { %v498_v15 = vadd.f32 %v497_v10, %v415_v9 }
 0x392   :  { %v499_v14 = vpop.f32.mrf.mxu1 }
 0x393   :  { %v506_v18 = vmax.f32 %v498_v15, 0.0  ;;  %v500_v38 = vadd.f32 %v499_v14, %v419_v33 }
 0x394   :  { %v501_v16 = vpop.f32.mrf.mxu1 }
 0x395   :  { %v502_v17 = vadd.f32 %v501_v16, %v415_v9  ;;  %v754_v9 = vrot.slane %v1820_v13, %v753_v8 }
 0x396   :  { %v503_v36 = vpop.f32.mrf.mxu1 }
 0x397   :  { %v507_v19 = vmax.f32 %v502_v17, 0.0  ;;  %v504_v40 = vadd.f32 %v503_v36, %v419_v33 }
 0x399   :  { %v508_v20 = vpack.c.bf16 %v507_v19, %v506_v18 }
 0x39b   :  { %1335 = vmatmul.mubr.bf16.vlgmr.msra.gmra.mxu0 %v508_v20 }
 0x39c   :  { %1374 = vmatprep.mubr.msk.bf16.mxu0 %vm1684_vm0, %v1683_v0  ;;  %1359 = vmatpush3.bf16.msra.mxu0 %v1477_v24  ;;  %v1494_v24 = vld [vmem:[#allocation13 + $0x10] sm:$0xff]  }
 0x39d   :  { %1360 = vmatprep.subr.bf16.mxu0 %v1683_v0 }
 0x3a0   :  { %1361 = vmatpush3.bf16.msra.mxu0 %v1478_v25  ;;  %v1495_v25 = vld [vmem:[#allocation13 + $0x8] sm:$0xff]  }
 0x3a1   :  { %1362 = vmatprep.subr.bf16.mxu0 %v1683_v0 }
 0x3a4   :  { %1363 = vmatpush3.bf16.msra.mxu0 %v1479_v26  ;;  %v1496_v26 = vld [vmem:[#allocation13] sm:$0xff]  }
 0x3a5   :  { %1364 = vmatprep.subr.bf16.mxu0 %v1683_v0 }
 0x3a8   :  { %1365 = vmatpush3.bf16.msra.mxu0 %v1480_v28  ;;  %v867_v28 = vsub.s32 7, %v1817_v11 }
 0x3a9   :  { %1366 = vmatprep.subr.bf16.mxu0 %v1683_v0 }
 0x3aa   :  { %v868_v30 = vrot.slane %v1820_v13, %v867_v28  ;;  %v1499_v13 = vld [vmem:[%s1982_s11 + $0x8] sm:$0xff]  }
 0x3ac   :  { %1367 = vmatpush3.bf16.msra.mxu0 %v1481_v29  ;;  %v1497_v29 = vld [vmem:[%s1982_s11 + $0x18] sm:$0xff]  }
 0x3ad   :  { %1368 = vmatprep.subr.bf16.mxu0 %v1683_v0 }
 0x3b0   :  { %1369 = vmatpush3.bf16.msra.mxu0 %v1482_v48 }
 0x3b1   :  { %1370 = vmatprep.subr.bf16.mxu0 %v1683_v0 }
 0x3b4   :  { %1371 = vmatpush3.bf16.msra.mxu0 %v1483_v49 }
 0x3b5   :  { %1372 = vmatprep.subr.bf16.mxu0 %v1683_v0 }
 0x3b8   :  { %1373 = vmatpush3.bf16.msra.mxu0 %v1484_v50 }
 0x3b9   :  { %1398 = vmatprep.subr.bf16.mxu0 %v1683_v0 }
 0x45b   :  { %v611_v34 = vpop.f32.mrf.mxu0 }
 0x45c   :  { %v612_v35 = vadd.f32 %v611_v34, %v528_v32 }
 0x45d   :  { %v1336_v37 = vpop.f32.mrf.mxu0 }
 0x45e   :  { %v1910_v41 = vadd.f32 %v612_v35, %v500_v38 }
 0x45f   :  { %v614_v39 = vpop.f32.mrf.mxu0 }
 0x460   :  { %v615_v42 = vadd.f32 %v614_v39, %v528_v32  ;;  %v620_v45 = vmax.f32 %v1910_v41, 0.0  ;;  %v1500_v41 = vld [vmem:[%s1982_s11] sm:$0xff]  }
 0x461   :  { %v1337_v43 = vpop.f32.mrf.mxu0 }
 0x462   :  { %v1912_v44 = vadd.f32 %v615_v42, %v504_v40  ;;  %v1498_v40 = vld [vmem:[%s1982_s11 + $0x10] sm:$0xff]  }
 0x463   :  { %v153_v42 = vld [vmem:[#allocation2 + $0x10] sm:$0x3] }
 0x464   :  { %v621_v46 = vmax.f32 %v1912_v44, 0.0  ;;  %v972_v43 = vrot.slane %v153_v42, %v164_v12  ;;  %v1065_v56 = vrot.slane %v153_v42, %v245_v27 }
 0x466   :  { %v622_v47 = vpack.c.bf16 %v621_v46, %v620_v45 }
 0x468   :  { %1355 = vmatmul.mubr.bf16.vlgmr.msra.gmra.mxu1 %v622_v47 }
 0x469   :  { %1394 = vmatprep.mubr.msk.bf16.mxu1 %vm1684_vm0, %v1683_v0  ;;  %1379 = vmatpush3.bf16.msra.mxu1 %v1485_v51 }
 0x46a   :  { %1380 = vmatprep.subr.bf16.mxu1 %v1683_v0 }
 0x46d   :  { %1381 = vmatpush3.bf16.msra.mxu1 %v1486_v52 }
 0x46e   :  { %1382 = vmatprep.subr.bf16.mxu1 %v1683_v0 }
 0x471   :  { %1383 = vmatpush3.bf16.msra.mxu1 %v1487_v53 }
 0x472   :  { %1384 = vmatprep.subr.bf16.mxu1 %v1683_v0 }
 0x475   :  { %1385 = vmatpush3.bf16.msra.mxu1 %v1488_v54 }
 0x476   :  { %1386 = vmatprep.subr.bf16.mxu1 %v1683_v0 }
 0x479   :  { %1387 = vmatpush3.bf16.msra.mxu1 %v1489_v55 }
 0x47a   :  { %1388 = vmatprep.subr.bf16.mxu1 %v1683_v0 }
 0x47d   :  { %1389 = vmatpush3.bf16.msra.mxu1 %v1490_v4 }
 0x47e   :  { %1390 = vmatprep.subr.bf16.mxu1 %v1683_v0 }
 0x481   :  { %1391 = vmatpush3.bf16.msra.mxu1 %v1491_v5 }
 0x482   :  { %1392 = vmatprep.subr.bf16.mxu1 %v1683_v0 }
 0x485   :  { %1393 = vmatpush3.bf16.msra.mxu1 %v1492_v6 }
 0x486   :  { %1410 = vmatprep.subr.bf16.mxu1 %v1683_v0 }
 0x528   :  { %v725_v58 = vpop.f32.mrf.mxu1 }
 0x529   :  { %v726_v60 = vadd.f32 %v725_v58, %v642_v57 }
 0x52a   :  { %v1356_v59 = vpop.f32.mrf.mxu1 }
 0x52b   :  { %v732_v1 = vmax.f32 %v726_v60, 0.0 }
 0x52c   :  { %v728_v61 = vpop.f32.mrf.mxu1 }
 0x52d   :  { %v729_v62 = vadd.f32 %v728_v61, %v642_v57 }
 0x52e   :  { %v1357_v63 = vpop.f32.mrf.mxu1 }
 0x52f   :  { %v733_v2 = vmax.f32 %v729_v62, 0.0 }
 0x531   :  { %v734_v3 = vpack.c.bf16 %v733_v2, %v732_v1 }
 0x533   :  { %1375 = vmatmul.mubr.bf16.vlgmr.msra.gmra.mxu0 %v734_v3 }
 0x534   :  { %1406 = vmatprep.mubr.msk.bf16.mxu0 %vm1684_vm0, %v1683_v0  ;;  %1399 = vmatpush3.bf16.msra.mxu0 %v1493_v7 }
 0x535   :  { %1400 = vmatprep.subr.bf16.mxu0 %v1683_v0 }
 0x538   :  { %1401 = vmatpush3.bf16.msra.mxu0 %v1494_v24 }
 0x539   :  { %1402 = vmatprep.subr.bf16.mxu0 %v1683_v0 }
 0x53c   :  { %1403 = vmatpush3.bf16.msra.mxu0 %v1495_v25 }
 0x53d   :  { %1404 = vmatprep.subr.bf16.mxu0 %v1683_v0 }
 0x540   :  { %1405 = vmatpush3.bf16.msra.mxu0 %v1496_v26 }
 0x5f3   :  { %v837_v10 = vpop.f32.mrf.mxu0 }
 0x5f4   :  { %v838_v14 = vadd.f32 %v837_v10, %v754_v9 }
 0x5f5   :  { %v1376_v15 = vpop.f32.mrf.mxu0 }
 0x5f6   :  { %v844_v17 = vadd.f32 %v838_v14, %v620_v45 }
 0x5f7   :  { %v840_v16 = vpop.f32.mrf.mxu0 }
 0x5f8   :  { %v841_v18 = vadd.f32 %v840_v16, %v754_v9  ;;  %v846_v21 = vmax.f32 %v844_v17, 0.0 }
 0x5f9   :  { %v1377_v19 = vpop.f32.mrf.mxu0 }
 0x5fa   :  { %v845_v20 = vadd.f32 %v841_v18, %v621_v46 }
 0x5fc   :  { %v847_v22 = vmax.f32 %v845_v20, 0.0 }
 0x5fe   :  { %v848_v23 = vpack.c.bf16 %v847_v22, %v846_v21 }
 0x600   :  { %1395 = vmatmul.mubr.bf16.vlgmr.msra.gmra.mxu1 %v848_v23 }
 0x601   :  { %1418 = vmatprep.mubr.msk.bf16.mxu1 %vm1684_vm0, %v1683_v0  ;;  %1411 = vmatpush3.bf16.msra.mxu1 %v1497_v29 }
 0x602   :  { %1412 = vmatprep.subr.bf16.mxu1 %v1683_v0 }
 0x605   :  { %1413 = vmatpush3.bf16.msra.mxu1 %v1498_v40 }
 0x606   :  { %1414 = vmatprep.subr.bf16.mxu1 %v1683_v0 }
 0x609   :  { %1415 = vmatpush3.bf16.msra.mxu1 %v1499_v13 }
 0x60a   :  { %1416 = vmatprep.subr.bf16.mxu1 %v1683_v0 }
 0x60d   :  { %1417 = vmatpush3.bf16.msra.mxu1 %v1500_v41 }
 0x6c0   :  { %v951_v31 = vpop.f32.mrf.mxu1 }
 0x6c1   :  { %v952_v32 = vadd.f32 %v951_v31, %v868_v30 }
 0x6c2   :  { %v1396_v33 = vpop.f32.mrf.mxu1 }
 0x6c3   :  { %1043 = vrot.lane.b32.xlu0 %v952_v32, %s1672_s24  ;;  %v958_v37 = vmax.f32 %v952_v32, 0.0 }
 0x6c4   :  { %v954_v34 = vpop.f32.mrf.mxu1 }
 0x6c5   :  { %v955_v35 = vadd.f32 %v954_v34, %v868_v30 }
 0x6c6   :  { %v1397_v36 = vpop.f32.mrf.mxu1 }
 0x6c7   :  { %v959_v38 = vmax.f32 %v955_v35, 0.0  ;;  %1045 = vrot.lane.b32.xlu0 %v955_v35, %s1672_s24 }
 0x6c9   :  { %v960_v39 = vpack.c.bf16 %v959_v38, %v958_v37 }
 0x6cb   :  { %1407 = vmatmul.mubr.msk.bf16.vlgmr.msra.gmra.mxu0 %vm271_vm2, %v960_v39 }
 0x735   :  { %v1044_v44 = vpop.permute.xlu0 %1043 }
 0x739   :  { %v1046_v51 = vpop.permute.xlu0 %1045 }
 0x78b   :  { %v1034_v45 = vpop.f32.mrf.mxu0 }
 0x78c   :  { %v1035_v46 = vadd.f32 %v1034_v45, %v972_v43 }
 0x78d   :  { %v1408_v47 = vpop.f32.mrf.mxu0 }
 0x78e   :  { %v1049_v49 = vadd.f32 %v1044_v44, %v1035_v46 }
 0x78f   :  { %v1037_v48 = vpop.f32.mrf.mxu0 }
 0x790   :  { %v1038_v50 = vadd.f32 %v1037_v48, %v972_v43  ;;  %v1051_v0 = vmax.f32 %v1049_v49, 0.0 }
 0x791   :  { %v1409_v52 = vpop.f32.mrf.mxu0 }
 0x792   :  { %v1050_v53 = vadd.f32 %v1046_v51, %v1038_v50 }
 0x794   :  { %v1052_v54 = vmax.f32 %v1050_v53, 0.0 }
 0x796   :  { %v1053_v55 = vpack.c.bf16 %v1052_v54, %v1051_v0 }
 0x798   :  { %1419 = vmatmul.mubr.msk.bf16.vlgmr.msra.gmra.mxu1 %vm271_vm2, %v1053_v55 }
 0x858   :  { %v1127_v57 = vpop.f32.mrf.mxu1 }
 0x859   :  { %v1128_v12 = vadd.f32 %v1127_v57, %v1065_v56 }
 0x85a   :  { %v1420_v58 = vpop.f32.mrf.mxu1 }
 0x85b   :  { %v1222_v59 = vpack.c.bf16 %v1128_v12, %v1128_v12 }
 0x85c   :  { %v1130_v60 = vpop.f32.mrf.mxu1 }
 0x85d   :  { %1143 = vst.msk [vmem:[%s1983_s12] sm:$0xf] %vm1142_vm3, %v1222_v59  ;;  %v1131_v61 = vadd.f32 %v1130_v60, %v1065_v56 }
 0x85e   :  { %v1421_v62 = vpop.f32.mrf.mxu1 }
 0x85f   :  { %v1223_v63 = vpack.c.bf16 %v1131_v61, %v1131_v61 }
 0x861   :  { %1144 = vst.msk [vmem:[%s1983_s12 + $0x4] sm:$0xf] %vm1142_vm3, %v1223_v63 }
 0x862   :  { %1149 = vsyncpa [#allocation3], 1 }
 0x863   :  { %1150 = vsyncpa [#allocation5], 1 }
 0x864   :  { %1151 = vsyncpa [#allocation8], 1 }
 0x865   :  { %1152 = vsyncpa [#allocation11], 1 }
 0x866   :  { %1153 = vsyncpa [#allocation14], 1 }

</bundles_post_ra>
